<compile_context>
chip_gen: v5e
topology: v5e:2x2
jax: 0.10.0
libtpu: 0.0.40
codegen_flags: <defaults>
</compile_context>

<pallas_src>
import functools
import math

import jax
import jax.numpy as jnp
from jax import lax
from jax.experimental import pallas as pl
from jax.experimental.pallas import tpu as pltpu


def _round_up(n, m):
    return ((n + m - 1) // m) * m


def _chip_kind():
    try:
        return jax.devices()[0].device_kind.lower()
    except Exception:
        return ""


def _default_vmem_limit():
    kind = _chip_kind()
    if "v7" in kind:
        return 48 * 1024 * 1024      # 64 MiB/TC physical: leave Mosaic headroom
    if "v5" in kind or "v6" in kind:
        return 96 * 1024 * 1024      # 128 MiB/TC: allow bigger tiles / buffers
    return 48 * 1024 * 1024


def _default_tile_li():
    kind = _chip_kind()
    # v5e MXU is 4x128^2 (M=128 saturates it); v6e/v7x are 2x256^2 (want M>=256)
    return 128 if ("v5e" in kind or "v5 lite" in kind) else 256


def _biattention_kernel(x_ref, mem_ref, win_ref, scale_ref, bias_ref,
                        out_ref, o2_ref,
                        xs_sc, idot_sc, m1_sc, l1_sc, acc_sc,
                        m2_sc, l2_sc, num2_sc, *, li_total):
    i = pl.program_id(1)            # Li tile
    k = pl.program_id(2)            # Lm tile
    n_li = pl.num_programs(1)
    n_lm = pl.num_programs(2)
    tl = x_ref.shape[1]
    d = x_ref.shape[2]

    # ---- per-Li-tile setup (hoisted out of the Lm loop) --------------------
    @pl.when(k == 0)
    def _():
        x0 = x_ref[0]                                        # (TL, D) f32
        xs_sc[...] = (x0 * scale_ref[...]).astype(xs_sc.dtype)   # bf16 MXU operand
        idot_sc[...] = jnp.sum(x0 * win_ref[...], axis=-1, keepdims=True)
        m1_sc[...] = jnp.full(m1_sc.shape, -jnp.inf, m1_sc.dtype)
        l1_sc[...] = jnp.zeros(l1_sc.shape, l1_sc.dtype)
        acc_sc[...] = jnp.zeros(acc_sc.shape, acc_sc.dtype)

    # ---- per-batch setup for the second (global) softmax -------------------
    @pl.when((i == 0) & (k == 0))
    def _():
        m2_sc[...] = jnp.full(m2_sc.shape, -jnp.inf, m2_sc.dtype)
        l2_sc[...] = jnp.zeros(l2_sc.shape, l2_sc.dtype)
        num2_sc[...] = jnp.zeros(num2_sc.shape, num2_sc.dtype)

    mem_b = mem_ref[0]                                       # (TLM, D) bf16 (pre-cast)

    # cross scores: (input*scale) @ memory^T, bf16 operands / f32 accumulation
    cross = lax.dot_general(xs_sc[...], mem_b, (((1,), (1,)), ((), ())),
                            preferred_element_type=jnp.float32)   # (TL, TLM)
    # bias already holds memory_dot - 1e30*(1 - mask)  (precomputed per batch)
    att = cross + idot_sc[...] + bias_ref[0]

    # ---- online softmax over memory tiles (weight_one / output_one) --------
    m_prev = m1_sc[...]
    m_new = jnp.maximum(m_prev, jnp.max(att, axis=-1, keepdims=True))
    alpha = jnp.exp(m_prev - m_new)                          # (TL, 1)
    p = jnp.exp(att - m_new)                                 # (TL, TLM) f32
    l1_sc[...] = alpha * l1_sc[...] + jnp.sum(p, axis=-1, keepdims=True)
    acc_sc[...] = alpha * acc_sc[...] + jnp.dot(
        p.astype(jnp.bfloat16), mem_b, preferred_element_type=jnp.float32)
    m1_sc[...] = m_new

    # ---- finalize this Li tile on the last memory tile ----------------------
    @pl.when(k == n_lm - 1)
    def _():
        x = x_ref[0]
        o1 = acc_sc[...] * pl.reciprocal(l1_sc[...], approx=True)   # (TL, D)

        if d % 128 == 0:
            # lane-aligned: direct chunk stores; chunk 3 is written by the
            # aliased epilogue kernel (it duplicates chunk 1 otherwise).
            out_ref[0, :, 0:d] = x.astype(out_ref.dtype)
            out_ref[0, :, d:2 * d] = o1.astype(out_ref.dtype)
            out_ref[0, :, 2 * d:3 * d] = (x * o1).astype(out_ref.dtype)
        else:
            # small / unaligned D: one lane-dense full-row store (chunk 3 is a
            # placeholder; the epilogue overwrites it).
            out_ref[0] = jnp.concatenate(
                [x, o1, x * o1, o1], axis=-1).astype(out_ref.dtype)

        # ---- online accumulation of output_two = softmax_Li(row_max) @ input
        # m1_sc now holds the row max of att over the full memory length.
        row_ids = i * tl + lax.broadcasted_iota(jnp.int32, (tl, 1), 0)
        rm = jnp.where(row_ids < li_total, m1_sc[...], -jnp.inf)    # drop Li pad
        tmax = jnp.max(rm, axis=0, keepdims=True)                   # (1, 1)
        g_prev = m2_sc[...]
        g_new = jnp.maximum(g_prev, tmax)
        beta = jnp.exp(g_prev - g_new)
        p2 = jnp.exp(rm - g_new)                                    # (TL, 1)
        l2_sc[...] = beta * l2_sc[...] + jnp.sum(p2, axis=0, keepdims=True)
        num2_sc[...] = beta * num2_sc[...] + jnp.sum(p2 * x, axis=0,
                                                     keepdims=True)
        m2_sc[...] = g_new

        @pl.when(i == n_li - 1)
        def _():
            # exact reciprocal: once per batch, scales the whole output_two
            o2_ref[0] = (num2_sc[...] / l2_sc[...]).astype(o2_ref.dtype)


def _finalize_kernel(src_ref, o2_ref, out_ref):
    """In-place (aliased) epilogue: chunk3 = output_two * output_one."""
    d = o2_ref.shape[2]
    blk = src_ref[0]                                   # (T, 4D)
    o1 = blk[:, d:2 * d].astype(jnp.float32)
    c3 = (o1 * o2_ref[0]).astype(out_ref.dtype)
    if d % 128 == 0:
        out_ref[0, :, :3 * d] = blk[:, :3 * d]
        out_ref[0, :, 3 * d:] = c3
    else:
        out_ref[0] = jnp.concatenate([blk[:, :3 * d], c3], axis=-1)


def biattention(x, memory, w_in, w_mem, dot_scale, mask, *,
                tile_li=None, tile_lm=512, vmem_limit_bytes=None):
    """x: (B, Li, D), memory: (B, Lm, D), mask: (B, Lm) in {0,1}."""
    bsz, li, d = x.shape
    lm = memory.shape[1]

    if tile_li is None:
        tile_li = _default_tile_li()
    if vmem_limit_bytes is None:
        vmem_limit_bytes = _default_vmem_limit()

    # TPU-friendly tiling: Li tiles are sublane-aligned (8), Lm tiles are
    # lane-aligned (128) so score rows are lane-dense.
    tile_li = max(8, min(_round_up(tile_li, 8), _round_up(li, 8)))
    tile_lm = max(128, min(_round_up(tile_lm, 128), _round_up(lm, 128)))
    li_pad = _round_up(li, tile_li)
    lm_pad = _round_up(lm, tile_lm)
    n_li = li_pad // tile_li
    n_lm = lm_pad // tile_lm

    xf = x.astype(jnp.float32)
    if li_pad != li:
        xf = jnp.pad(xf, ((0, 0), (0, li_pad - li), (0, 0)))

    # memory is passed to the kernel already in bf16 (hoisted cast).
    mem_b = memory.astype(jnp.bfloat16)
    if lm_pad != lm:
        mem_b = jnp.pad(mem_b, ((0, 0), (0, lm_pad - lm), (0, 0)))

    # Per-batch score bias: memory_dot - 1e30*(1 - mask); padded memory
    # positions are always fully masked (-1e30).
    memory_dot = jnp.einsum('bjd,d->bj', memory.astype(jnp.float32),
                            w_mem.reshape(-1).astype(jnp.float32))
    bias = memory_dot - 1e30 * (1.0 - mask.astype(jnp.float32))
    bias = jnp.pad(bias, ((0, 0), (0, lm_pad - lm)),
                   constant_values=-1e30)[:, None, :]          # (B, 1, Lm_pad)

    win = w_in.reshape(1, d).astype(jnp.float32)
    scale = dot_scale.reshape(1, d).astype(jnp.float32)

    kernel = functools.partial(_biattention_kernel, li_total=li)

    out_pad, o2 = pl.pallas_call(
        kernel,
        out_shape=(
            jax.ShapeDtypeStruct((bsz, li_pad, 4 * d), x.dtype),
            jax.ShapeDtypeStruct((bsz, 1, d), jnp.float32),
        ),
        grid_spec=pltpu.PrefetchScalarGridSpec(
            num_scalar_prefetch=0,
            grid=(bsz, n_li, n_lm),
            in_specs=[
                pl.BlockSpec((1, tile_li, d), lambda b, i, k: (b, i, 0)),   # input tile
                pl.BlockSpec((1, tile_lm, d), lambda b, i, k: (b, k, 0)),   # memory tile (bf16)
                pl.BlockSpec((1, d), lambda b, i, k: (0, 0)),               # input_linear.weight
                pl.BlockSpec((1, d), lambda b, i, k: (0, 0)),               # dot_scale
                pl.BlockSpec((1, 1, tile_lm), lambda b, i, k: (b, 0, k)),   # memory_dot/mask bias
            ],
            out_specs=[
                pl.BlockSpec((1, tile_li, 4 * d), lambda b, i, k: (b, i, 0)),  # main output
                pl.BlockSpec((1, 1, d), lambda b, i, k: (b, 0, 0)),            # output_two
            ],
            scratch_shapes=[
                pltpu.VMEM((tile_li, d), jnp.bfloat16),   # (input*scale) bf16, per Li tile
                pltpu.VMEM((tile_li, 1), jnp.float32),    # input_dot, per Li tile
                pltpu.VMEM((tile_li, 1), jnp.float32),    # running row max (softmax #1)
                pltpu.VMEM((tile_li, 1), jnp.float32),    # running denom   (softmax #1)
                pltpu.VMEM((tile_li, d), jnp.float32),    # output_one numerator
                pltpu.VMEM((1, 1), jnp.float32),          # running max   (softmax #2)
                pltpu.VMEM((1, 1), jnp.float32),          # running denom (softmax #2)
                pltpu.VMEM((1, d), jnp.float32),          # output_two numerator
            ],
        ),
        # NOTE: the Li and Lm axes carry flash-style accumulators and must
        # remain "arbitrary" (sequential per batch); never promote to parallel.
        compiler_params=pltpu.CompilerParams(
            dimension_semantics=("parallel", "arbitrary", "arbitrary"),
            vmem_limit_bytes=vmem_limit_bytes),
    )(xf, mem_b, win, scale, bias)

    # In-place epilogue: chunk3 = output_two * output_one (read from chunk 1),
    # aliased so no extra full-output HBM copies.
    out_pad = pl.pallas_call(
        _finalize_kernel,
        out_shape=jax.ShapeDtypeStruct((bsz, li_pad, 4 * d), x.dtype),
        grid=(bsz, n_li),
        in_specs=[
            pl.BlockSpec((1, tile_li, 4 * d), lambda b, i: (b, i, 0)),
            pl.BlockSpec((1, 1, d), lambda b, i: (b, 0, 0)),
        ],
        out_specs=pl.BlockSpec((1, tile_li, 4 * d), lambda b, i: (b, i, 0)),
        input_output_aliases={0: 0},
        compiler_params=pltpu.CompilerParams(
            dimension_semantics=("parallel", "parallel"),
            vmem_limit_bytes=vmem_limit_bytes),
    )(out_pad, o2)

    if li_pad != li:
        out_pad = out_pad[:, :li, :]
    return out_pad


def biattention_ref(x, memory, w_in, w_mem, dot_scale, mask,
                    mxu_dtype=jnp.float32):
    """Pure-JAX reference mirroring the PyTorch forward (dropout = identity).

    mxu_dtype=jnp.bfloat16 mirrors the kernel's mixed-precision matmuls
    (bf16 operands, f32 accumulation); jnp.float32 is the exact module math.
    """
    input_dot = jnp.sum(x * w_in.reshape(1, 1, -1), axis=-1, keepdims=True)
    memory_dot = jnp.sum(memory * w_mem.reshape(1, 1, -1), axis=-1)[:, None, :]
    xs = (x * dot_scale).astype(mxu_dtype)
    mem_c = memory.astype(mxu_dtype)
    cross = jnp.einsum('bid,bjd->bij', xs, mem_c,
                       preferred_element_type=jnp.float32)
    att = input_dot + memory_dot + cross - 1e30 * (1.0 - mask[:, None, :])
    w1 = jax.nn.softmax(att, axis=-1)
    o1 = jnp.einsum('bij,bjd->bid', w1.astype(mxu_dtype), mem_c,
                    preferred_element_type=jnp.float32)
    w2 = jax.nn.softmax(jnp.max(att, axis=-1), axis=-1)
    o2 = jnp.einsum('bi,bid->bd', w2, x)[:, None, :]
    return jnp.concatenate([x, o1, x * o1, o2 * o1], axis=-1)


def _make_inputs(key, bsz, li, lm, d):
    k_x, k_m, k_win, k_wmem, k_scale = jax.random.split(key, 5)
    x = jax.random.normal(k_x, (bsz, li, d), dtype=jnp.float32)
    memory = jax.random.normal(k_m, (bsz, lm, d), dtype=jnp.float32)
    # nn.Linear(input_size, 1, bias=False): weight (1, input_size)
    bound = 1.0 / math.sqrt(d)
    w_in = jax.random.uniform(k_win, (1, d), minval=-bound, maxval=bound,
                              dtype=jnp.float32)
    w_mem = jax.random.uniform(k_wmem, (1, d), minval=-bound, maxval=bound,
                               dtype=jnp.float32)
    # dot_scale ~ Uniform(1/sqrt(input_size), 1.0)
    dot_scale = jax.random.uniform(k_scale, (d,), minval=bound, maxval=1.0,
                                   dtype=jnp.float32)
    # mask: batch 0 fully valid, batch 1 has the last 2 memory positions masked
    mask = jnp.ones((bsz, lm), dtype=jnp.float32)
    mask = mask.at[1, -2:].set(0.0)
    return x, memory, w_in, w_mem, dot_scale, mask


if __name__ == "__main__":
    key1, key2 = jax.random.split(jax.random.PRNGKey(0))

    # Case 1: small, unaligned D=32; tile_li=8 -> 2 Li tiles (exercises the
    # cross-tile global softmax for output_two); single Lm tile.
    args1 = _make_inputs(key1, 2, 16, 8, 32)
    run = jax.jit(functools.partial(biattention, tile_li=8, tile_lm=128))
    out1 = jax.block_until_ready(run(*args1))
    assert out1.shape == (2, 16, 4 * 32)
    # chunk 0 is a pure copy of the input
    assert jnp.allclose(out1[..., :32], args1[0], atol=1e-6)
    ref1 = biattention_ref(*args1, mxu_dtype=jnp.bfloat16)
    assert jnp.allclose(out1, ref1, rtol=5e-2, atol=5e-2), "case-1 mismatch"

    # Case 2: lane-aligned D=128, Lm=160 -> 2 Lm tiles at tile_lm=128
    # (exercises the flash-style online softmax over memory tiles) plus
    # 2 Li tiles (tile_li=8).
    args2 = _make_inputs(key2, 2, 16, 160, 128)
    out2 = jax.block_until_ready(run(*args2))
    assert out2.shape == (2, 16, 4 * 128)
    assert jnp.allclose(out2[..., :128], args2[0], atol=1e-6)
    ref2 = biattention_ref(*args2, mxu_dtype=jnp.bfloat16)
    assert jnp.allclose(out2, ref2, rtol=5e-2, atol=5e-2), "case-2 mismatch"

    print("KERNEL_OK")
</pallas_src>

<mosaic_0001>
module attributes {stable_mosaic.version = 11 : i64} {
  func.func @_finalize_kernel(%arg0: i32, %arg1: i32, %arg2: memref<1x8x128xf32, #tpu.memory_space<vmem>>, %arg3: memref<1x1x32xf32, #tpu.memory_space<vmem>>, %arg4: memref<1x8x128xf32, #tpu.memory_space<vmem>>) attributes {dimension_semantics = [#tpu.dimension_semantics<parallel>, #tpu.dimension_semantics<parallel>], iteration_bounds = array<i64: 2, 2>, scalar_prefetch = 0 : i64, scratch_operands = 0 : i64, tpu.core_type = #tpu.core_type<tc>, window_params = [{transform_indices = @transform_0, window_bounds = array<i64: 1, 8, 128>}, {transform_indices = @transform_1, window_bounds = array<i64: 1, 1, 32>}, {transform_indices = @transform_2, window_bounds = array<i64: 1, 8, 128>}]} {
    %c0 = arith.constant 0 : index
    %c0_0 = arith.constant 0 : index
    %c0_1 = arith.constant 0 : index
    %0 = vector.load %arg2[%c0, %c0_0, %c0_1] : memref<1x8x128xf32, #tpu.memory_space<vmem>>, vector<1x8x128xf32>
    %1 = vector.shape_cast %0 : vector<1x8x128xf32> to vector<8x128xf32>
    %2 = vector.extract_strided_slice %1 {offsets = [0, 32], sizes = [8, 32], strides = [1, 1]} : vector<8x128xf32> to vector<8x32xf32>
    %c0_2 = arith.constant 0 : index
    %c0_3 = arith.constant 0 : index
    %c0_4 = arith.constant 0 : index
    %3 = vector.load %arg3[%c0_2, %c0_3, %c0_4] : memref<1x1x32xf32, #tpu.memory_space<vmem>>, vector<1x1x32xf32>
    %4 = vector.shape_cast %3 : vector<1x1x32xf32> to vector<1x32xf32>
    %5 = vector.broadcast %4 : vector<1x32xf32> to vector<8x32xf32>
    %6 = arith.mulf %2, %5 : vector<8x32xf32>
    %7 = vector.extract_strided_slice %1 {offsets = [0, 0], sizes = [8, 96], strides = [1, 1]} : vector<8x128xf32> to vector<8x96xf32>
    %8 = tpu.concatenate %7, %6 in 1 : vector<8x96xf32>, vector<8x32xf32> -> vector<8x128xf32>
    %c0_5 = arith.constant 0 : index
    %c0_6 = arith.constant 0 : index
    %c0_7 = arith.constant 0 : index
    %9 = vector.load %arg4[%c0_5, %c0_6, %c0_7] : memref<1x8x128xf32, #tpu.memory_space<vmem>>, vector<1x8x128xf32>
    %10 = vector.shape_cast %9 : vector<1x8x128xf32> to vector<8x128xf32>
    %11 = vector.shape_cast %8 : vector<8x128xf32> to vector<1x8x128xf32>
    tpu.vector_store %arg4[%c0_5, %c0_6, %c0_7], %11 {strides = array<i32>} : memref<1x8x128xf32, #tpu.memory_space<vmem>>, vector<1x8x128xf32>,
    return
  }
  func.func @transform_0(%arg0: i32, %arg1: i32) -> (i32, i32, i32) {
    %c0_i32 = arith.constant 0 : i32
    %c0_i32_0 = arith.constant 0 : i32
    return %arg0, %arg1, %c0_i32 : i32, i32, i32
  }
  func.func @transform_1(%arg0: i32, %arg1: i32) -> (i32, i32, i32) {
    %c0_i32 = arith.constant 0 : i32
    %c0_i32_0 = arith.constant 0 : i32
    %c0_i32_1 = arith.constant 0 : i32
    return %arg0, %c0_i32, %c0_i32_0 : i32, i32, i32
  }
  func.func @transform_2(%arg0: i32, %arg1: i32) -> (i32, i32, i32) {
    %c0_i32 = arith.constant 0 : i32
    %c0_i32_0 = arith.constant 0 : i32
    return %arg0, %arg1, %c0_i32 : i32, i32, i32
  }
}

module attributes {stable_mosaic.version = 11 : i64} {
  func.func @_biattention_kernel(%arg0: i32, %arg1: i32, %arg2: i32, %arg3: memref<1x8x32xf32, #tpu.memory_space<vmem>>, %arg4: memref<1x128x32xbf16, #tpu.memory_space<vmem>>, %arg5: memref<1x32xf32, #tpu.memory_space<vmem>>, %arg6: memref<1x32xf32, #tpu.memory_space<vmem>>, %arg7: memref<1x1x128xf32, #tpu.memory_space<vmem>>, %arg8: memref<1x8x128xf32, #tpu.memory_space<vmem>>, %arg9: memref<1x1x32xf32, #tpu.memory_space<vmem>>, %arg10: memref<8x32xbf16, #tpu.memory_space<vmem>>, %arg11: memref<8x1xf32, #tpu.memory_space<vmem>>, %arg12: memref<8x1xf32, #tpu.memory_space<vmem>>, %arg13: memref<8x1xf32, #tpu.memory_space<vmem>>, %arg14: memref<8x32xf32, #tpu.memory_space<vmem>>, %arg15: memref<1x1xf32, #tpu.memory_space<vmem>>, %arg16: memref<1x1xf32, #tpu.memory_space<vmem>>, %arg17: memref<1x32xf32, #tpu.memory_space<vmem>>) attributes {dimension_semantics = [#tpu.dimension_semantics<parallel>, #tpu.dimension_semantics<arbitrary>, #tpu.dimension_semantics<arbitrary>], iteration_bounds = array<i64: 2, 2, 1>, scalar_prefetch = 0 : i64, scratch_operands = 8 : i64, tpu.core_type = #tpu.core_type<tc>, window_params = [{transform_indices = @transform_0, window_bounds = array<i64: 1, 8, 32>}, {transform_indices = @transform_1, window_bounds = array<i64: 1, 128, 32>}, {pipeline_mode = #tpu.pipeline_mode<synchronous>, transform_indices = @transform_2, window_bounds = array<i64: 1, 32>}, {pipeline_mode = #tpu.pipeline_mode<synchronous>, transform_indices = @transform_3, window_bounds = array<i64: 1, 32>}, {transform_indices = @transform_4, window_bounds = array<i64: 1, 1, 128>}, {transform_indices = @transform_5, window_bounds = array<i64: 1, 8, 128>}, {transform_indices = @transform_6, window_bounds = array<i64: 1, 1, 32>}]} {
    %c0_i32 = arith.constant 0 : i32
    %0 = arith.cmpi eq, %arg2, %c0_i32 : i32
    %1 = arith.extui %0 : i1 to i32
    %c0_i32_0 = arith.constant 0 : i32
    %2 = arith.cmpi ne, %1, %c0_i32_0 : i32
    scf.if %2 {
      %c0_30 = arith.constant 0 : index
      %c0_31 = arith.constant 0 : index
      %c0_32 = arith.constant 0 : index
      %45 = vector.load %arg3[%c0_30, %c0_31, %c0_32] : memref<1x8x32xf32, #tpu.memory_space<vmem>>, vector<1x8x32xf32>
      %46 = vector.shape_cast %45 : vector<1x8x32xf32> to vector<8x32xf32>
      %c0_33 = arith.constant 0 : index
      %c0_34 = arith.constant 0 : index
      %47 = vector.load %arg6[%c0_33, %c0_34] : memref<1x32xf32, #tpu.memory_space<vmem>>, vector<1x32xf32>
      %48 = vector.broadcast %47 : vector<1x32xf32> to vector<8x32xf32>
      %49 = arith.mulf %46, %48 : vector<8x32xf32>
      %50 = arith.truncf %49 : vector<8x32xf32> to vector<8x32xbf16>
      %c0_35 = arith.constant 0 : index
      %c0_36 = arith.constant 0 : index
      %51 = vector.load %arg10[%c0_35, %c0_36] : memref<8x32xbf16, #tpu.memory_space<vmem>>, vector<8x32xbf16>
      tpu.vector_store %arg10[%c0_35, %c0_36], %50 {strides = array<i32>} : memref<8x32xbf16, #tpu.memory_space<vmem>>, vector<8x32xbf16>,
      %c0_37 = arith.constant 0 : index
      %c0_38 = arith.constant 0 : index
      %52 = vector.load %arg5[%c0_37, %c0_38] : memref<1x32xf32, #tpu.memory_space<vmem>>, vector<1x32xf32>
      %53 = vector.broadcast %52 : vector<1x32xf32> to vector<8x32xf32>
      %54 = arith.mulf %46, %53 : vector<8x32xf32>
      %cst_39 = arith.constant dense<0.000000e+00> : vector<8xf32>
      %55 = vector.multi_reduction <add>, %54, %cst_39 [1] : vector<8x32xf32> to vector<8xf32>
      %56 = vector.shape_cast %55 : vector<8xf32> to vector<8x1xf32>
      %c0_40 = arith.constant 0 : index
      %c0_41 = arith.constant 0 : index
      %57 = vector.load %arg11[%c0_40, %c0_41] : memref<8x1xf32, #tpu.memory_space<vmem>>, vector<8x1xf32>
      tpu.vector_store %arg11[%c0_40, %c0_41], %56 {strides = array<i32>} : memref<8x1xf32, #tpu.memory_space<vmem>>, vector<8x1xf32>,
      %cst_42 = arith.constant 0xFF800000 : f32
      %58 = vector.broadcast %cst_42 : f32 to vector<8x1xf32>
      %c0_43 = arith.constant 0 : index
      %c0_44 = arith.constant 0 : index
      %59 = vector.load %arg12[%c0_43, %c0_44] : memref<8x1xf32, #tpu.memory_space<vmem>>, vector<8x1xf32>
      tpu.vector_store %arg12[%c0_43, %c0_44], %58 {strides = array<i32>} : memref<8x1xf32, #tpu.memory_space<vmem>>, vector<8x1xf32>,
      %cst_45 = arith.constant 0.000000e+00 : f32
      %60 = vector.broadcast %cst_45 : f32 to vector<8x1xf32>
      %c0_46 = arith.constant 0 : index
      %c0_47 = arith.constant 0 : index
      %61 = vector.load %arg13[%c0_46, %c0_47] : memref<8x1xf32, #tpu.memory_space<vmem>>, vector<8x1xf32>
      tpu.vector_store %arg13[%c0_46, %c0_47], %60 {strides = array<i32>} : memref<8x1xf32, #tpu.memory_space<vmem>>, vector<8x1xf32>,
      %cst_48 = arith.constant 0.000000e+00 : f32
      %62 = vector.broadcast %cst_48 : f32 to vector<8x32xf32>
      %c0_49 = arith.constant 0 : index
      %c0_50 = arith.constant 0 : index
      %63 = vector.load %arg14[%c0_49, %c0_50] : memref<8x32xf32, #tpu.memory_space<vmem>>, vector<8x32xf32>
      tpu.vector_store %arg14[%c0_49, %c0_50], %62 {strides = array<i32>} : memref<8x32xf32, #tpu.memory_space<vmem>>, vector<8x32xf32>,
    } else {
    }
    %c0_i32_1 = arith.constant 0 : i32
    %3 = arith.cmpi eq, %arg1, %c0_i32_1 : i32
    %c0_i32_2 = arith.constant 0 : i32
    %4 = arith.cmpi eq, %arg2, %c0_i32_2 : i32
    %5 = arith.andi %3, %4 : i1
    %6 = arith.extui %5 : i1 to i32
    %c0_i32_3 = arith.constant 0 : i32
    %7 = arith.cmpi ne, %6, %c0_i32_3 : i32
    scf.if %7 {
      %cst_30 = arith.constant 0xFF800000 : f32
      %45 = vector.broadcast %cst_30 : f32 to vector<1x1xf32>
      %c0_31 = arith.constant 0 : index
      %c0_32 = arith.constant 0 : index
      %46 = vector.load %arg15[%c0_31, %c0_32] : memref<1x1xf32, #tpu.memory_space<vmem>>, vector<1x1xf32>
      tpu.vector_store %arg15[%c0_31, %c0_32], %45 {strides = array<i32>} : memref<1x1xf32, #tpu.memory_space<vmem>>, vector<1x1xf32>,
      %cst_33 = arith.constant 0.000000e+00 : f32
      %47 = vector.broadcast %cst_33 : f32 to vector<1x1xf32>
      %c0_34 = arith.constant 0 : index
      %c0_35 = arith.constant 0 : index
      %48 = vector.load %arg16[%c0_34, %c0_35] : memref<1x1xf32, #tpu.memory_space<vmem>>, vector<1x1xf32>
      tpu.vector_store %arg16[%c0_34, %c0_35], %47 {strides = array<i32>} : memref<1x1xf32, #tpu.memory_space<vmem>>, vector<1x1xf32>,
      %cst_36 = arith.constant 0.000000e+00 : f32
      %49 = vector.broadcast %cst_36 : f32 to vector<1x32xf32>
      %c0_37 = arith.constant 0 : index
      %c0_38 = arith.constant 0 : index
      %50 = vector.load %arg17[%c0_37, %c0_38] : memref<1x32xf32, #tpu.memory_space<vmem>>, vector<1x32xf32>
      tpu.vector_store %arg17[%c0_37, %c0_38], %49 {strides = array<i32>} : memref<1x32xf32, #tpu.memory_space<vmem>>, vector<1x32xf32>,
    } else {
    }
    %c0 = arith.constant 0 : index
    %c0_4 = arith.constant 0 : index
    %c0_5 = arith.constant 0 : index
    %8 = vector.load %arg4[%c0, %c0_4, %c0_5] : memref<1x128x32xbf16, #tpu.memory_space<vmem>>, vector<1x128x32xbf16>
    %9 = vector.shape_cast %8 : vector<1x128x32xbf16> to vector<128x32xbf16>
    %c0_6 = arith.constant 0 : index
    %c0_7 = arith.constant 0 : index
    %10 = vector.load %arg10[%c0_6, %c0_7] : memref<8x32xbf16, #tpu.memory_space<vmem>>, vector<8x32xbf16>
    %cst = arith.constant dense<0.000000e+00> : vector<8x128xf32>
    %11 = tpu.matmul %10, %9, %cst {dimension_numbers = #tpu.dot_dimension_numbers<[1], [1], [0], [0], [0, 0, 1, 0], [], []>} : vector<8x32xbf16>, vector<128x32xbf16>, vector<8x128xf32> -> vector<8x128xf32>
    %c0_8 = arith.constant 0 : index
    %c0_9 = arith.constant 0 : index
    %12 = vector.load %arg11[%c0_8, %c0_9] : memref<8x1xf32, #tpu.memory_space<vmem>>, vector<8x1xf32>
    %13 = vector.broadcast %12 : vector<8x1xf32> to vector<8x128xf32>
    %14 = arith.addf %11, %13 : vector<8x128xf32>
    %c0_10 = arith.constant 0 : index
    %c0_11 = arith.constant 0 : index
    %c0_12 = arith.constant 0 : index
    %15 = vector.load %arg7[%c0_10, %c0_11, %c0_12] : memref<1x1x128xf32, #tpu.memory_space<vmem>>, vector<1x1x128xf32>
    %16 = vector.shape_cast %15 : vector<1x1x128xf32> to vector<1x128xf32>
    %17 = vector.broadcast %16 : vector<1x128xf32> to vector<8x128xf32>
    %18 = arith.addf %14, %17 : vector<8x128xf32>
    %c0_13 = arith.constant 0 : index
    %c0_14 = arith.constant 0 : index
    %19 = vector.load %arg12[%c0_13, %c0_14] : memref<8x1xf32, #tpu.memory_space<vmem>>, vector<8x1xf32>
    %cst_15 = arith.constant dense<0xFF800000> : vector<8xf32>
    %20 = vector.multi_reduction <maximumf>, %18, %cst_15 [1] : vector<8x128xf32> to vector<8xf32>
    %21 = vector.shape_cast %20 : vector<8xf32> to vector<8x1xf32>
    %22 = arith.maximumf %19, %21 : vector<8x1xf32>
    %23 = arith.subf %19, %22 : vector<8x1xf32>
    %24 = math.exp %23 : vector<8x1xf32>
    %25 = vector.broadcast %22 : vector<8x1xf32> to vector<8x128xf32>
    %26 = arith.subf %18, %25 : vector<8x128xf32>
    %27 = math.exp %26 : vector<8x128xf32>
    %c0_16 = arith.constant 0 : index
    %c0_17 = arith.constant 0 : index
    %28 = vector.load %arg13[%c0_16, %c0_17] : memref<8x1xf32, #tpu.memory_space<vmem>>, vector<8x1xf32>
    %29 = arith.mulf %24, %28 : vector<8x1xf32>
    %cst_18 = arith.constant dense<0.000000e+00> : vector<8xf32>
    %30 = vector.multi_reduction <add>, %27, %cst_18 [1] : vector<8x128xf32> to vector<8xf32>
    %31 = vector.shape_cast %30 : vector<8xf32> to vector<8x1xf32>
    %32 = arith.addf %29, %31 : vector<8x1xf32>
    %c0_19 = arith.constant 0 : index
    %c0_20 = arith.constant 0 : index
    %33 = vector.load %arg13[%c0_19, %c0_20] : memref<8x1xf32, #tpu.memory_space<vmem>>, vector<8x1xf32>
    tpu.vector_store %arg13[%c0_19, %c0_20], %32 {strides = array<i32>} : memref<8x1xf32, #tpu.memory_space<vmem>>, vector<8x1xf32>,
    %c0_21 = arith.constant 0 : index
    %c0_22 = arith.constant 0 : index
    %34 = vector.load %arg14[%c0_21, %c0_22] : memref<8x32xf32, #tpu.memory_space<vmem>>, vector<8x32xf32>
    %35 = vector.broadcast %24 : vector<8x1xf32> to vector<8x32xf32>
    %36 = arith.mulf %35, %34 : vector<8x32xf32>
    %37 = arith.truncf %27 : vector<8x128xf32> to vector<8x128xbf16>
    %cst_23 = arith.constant dense<0.000000e+00> : vector<8x32xf32>
    %38 = tpu.matmul %37, %9, %cst_23 {dimension_numbers = #tpu.dot_dimension_numbers<[1], [0], [0], [1], [0, 0, 1, 1], [], []>} : vector<8x128xbf16>, vector<128x32xbf16>, vector<8x32xf32> -> vector<8x32xf32>
    %39 = arith.addf %36, %38 : vector<8x32xf32>
    %c0_24 = arith.constant 0 : index
    %c0_25 = arith.constant 0 : index
    %40 = vector.load %arg14[%c0_24, %c0_25] : memref<8x32xf32, #tpu.memory_space<vmem>>, vector<8x32xf32>
    tpu.vector_store %arg14[%c0_24, %c0_25], %39 {strides = array<i32>} : memref<8x32xf32, #tpu.memory_space<vmem>>, vector<8x32xf32>,
    %c0_26 = arith.constant 0 : index
    %c0_27 = arith.constant 0 : index
    %41 = vector.load %arg12[%c0_26, %c0_27] : memref<8x1xf32, #tpu.memory_space<vmem>>, vector<8x1xf32>
    tpu.vector_store %arg12[%c0_26, %c0_27], %22 {strides = array<i32>} : memref<8x1xf32, #tpu.memory_space<vmem>>, vector<8x1xf32>,
    %c0_i32_28 = arith.constant 0 : i32
    %42 = arith.cmpi eq, %arg2, %c0_i32_28 : i32
    %43 = arith.extui %42 : i1 to i32
    %c0_i32_29 = arith.constant 0 : i32
    %44 = arith.cmpi ne, %43, %c0_i32_29 : i32
    scf.if %44 {
      %c0_30 = arith.constant 0 : index
      %c0_31 = arith.constant 0 : index
      %c0_32 = arith.constant 0 : index
      %45 = vector.load %arg3[%c0_30, %c0_31, %c0_32] : memref<1x8x32xf32, #tpu.memory_space<vmem>>, vector<1x8x32xf32>
      %46 = vector.shape_cast %45 : vector<1x8x32xf32> to vector<8x32xf32>
      %c0_33 = arith.constant 0 : index
      %c0_34 = arith.constant 0 : index
      %47 = vector.load %arg14[%c0_33, %c0_34] : memref<8x32xf32, #tpu.memory_space<vmem>>, vector<8x32xf32>
      %c0_35 = arith.constant 0 : index
      %c0_36 = arith.constant 0 : index
      %48 = vector.load %arg13[%c0_35, %c0_36] : memref<8x1xf32, #tpu.memory_space<vmem>>, vector<8x1xf32>
      %49 = tpu.reciprocal %48 {approx = true} : vector<8x1xf32> -> vector<8x1xf32>
      %50 = vector.broadcast %49 : vector<8x1xf32> to vector<8x32xf32>
      %51 = arith.mulf %47, %50 : vector<8x32xf32>
      %52 = arith.mulf %46, %51 : vector<8x32xf32>
      %53 = tpu.concatenate %46, %51, %52, %51 in 1 : vector<8x32xf32>, vector<8x32xf32>, vector<8x32xf32>, vector<8x32xf32> -> vector<8x128xf32>
      %c0_37 = arith.constant 0 : index
      %c0_38 = arith.constant 0 : index
      %c0_39 = arith.constant 0 : index
      %54 = vector.load %arg8[%c0_37, %c0_38, %c0_39] : memref<1x8x128xf32, #tpu.memory_space<vmem>>, vector<1x8x128xf32>
      %55 = vector.shape_cast %54 : vector<1x8x128xf32> to vector<8x128xf32>
      %56 = vector.shape_cast %53 : vector<8x128xf32> to vector<1x8x128xf32>
      tpu.vector_store %arg8[%c0_37, %c0_38, %c0_39], %56 {strides = array<i32>} : memref<1x8x128xf32, #tpu.memory_space<vmem>>, vector<1x8x128xf32>,
      %c8_i32 = arith.constant 8 : i32
      %57 = arith.muli %arg1, %c8_i32 : i32
      %58 = tpu.iota {dimensions = array<i32: 0>} : vector<8x1xi32>
      %59 = vector.broadcast %57 : i32 to vector<8x1xi32>
      %60 = arith.addi %59, %58 : vector<8x1xi32>
      %c16_i32 = arith.constant 16 : i32
      %61 = vector.broadcast %c16_i32 : i32 to vector<8x1xi32>
      %62 = arith.cmpi slt, %60, %61 : vector<8x1xi32>
      %c0_40 = arith.constant 0 : index
      %c0_41 = arith.constant 0 : index
      %63 = vector.load %arg12[%c0_40, %c0_41] : memref<8x1xf32, #tpu.memory_space<vmem>>, vector<8x1xf32>
      %cst_42 = arith.constant 0xFF800000 : f32
      %64 = vector.broadcast %cst_42 : f32 to vector<8x1xf32>
      %65 = arith.select %62, %63, %64 : vector<8x1xi1>, vector<8x1xf32>
      %cst_43 = arith.constant dense<0xFF800000> : vector<1xf32>
      %66 = vector.multi_reduction <maximumf>, %65, %cst_43 [0] : vector<8x1xf32> to vector<1xf32>
      %67 = vector.shape_cast %66 : vector<1xf32> to vector<1x1xf32>
      %c0_44 = arith.constant 0 : index
      %c0_45 = arith.constant 0 : index
      %68 = vector.load %arg15[%c0_44, %c0_45] : memref<1x1xf32, #tpu.memory_space<vmem>>, vector<1x1xf32>
      %69 = arith.maximumf %68, %67 : vector<1x1xf32>
      %70 = arith.subf %68, %69 : vector<1x1xf32>
      %71 = math.exp %70 : vector<1x1xf32>
      %72 = vector.broadcast %69 : vector<1x1xf32> to vector<8x1xf32>
      %73 = arith.subf %65, %72 : vector<8x1xf32>
      %74 = math.exp %73 : vector<8x1xf32>
      %c0_46 = arith.constant 0 : index
      %c0_47 = arith.constant 0 : index
      %75 = vector.load %arg16[%c0_46, %c0_47] : memref<1x1xf32, #tpu.memory_space<vmem>>, vector<1x1xf32>
      %76 = arith.mulf %71, %75 : vector<1x1xf32>
      %cst_48 = arith.constant dense<0.000000e+00> : vector<1xf32>
      %77 = vector.multi_reduction <add>, %74, %cst_48 [0] : vector<8x1xf32> to vector<1xf32>
      %78 = vector.shape_cast %77 : vector<1xf32> to vector<1x1xf32>
      %79 = arith.addf %76, %78 : vector<1x1xf32>
      %c0_49 = arith.constant 0 : index
      %c0_50 = arith.constant 0 : index
      %80 = vector.load %arg16[%c0_49, %c0_50] : memref<1x1xf32, #tpu.memory_space<vmem>>, vector<1x1xf32>
      tpu.vector_store %arg16[%c0_49, %c0_50], %79 {strides = array<i32>} : memref<1x1xf32, #tpu.memory_space<vmem>>, vector<1x1xf32>,
      %c0_51 = arith.constant 0 : index
      %c0_52 = arith.constant 0 : index
      %81 = vector.load %arg17[%c0_51, %c0_52] : memref<1x32xf32, #tpu.memory_space<vmem>>, vector<1x32xf32>
      %82 = vector.broadcast %71 : vector<1x1xf32> to vector<1x32xf32>
      %83 = arith.mulf %82, %81 : vector<1x32xf32>
      %84 = vector.broadcast %74 : vector<8x1xf32> to vector<8x32xf32>
      %85 = arith.mulf %84, %46 : vector<8x32xf32>
      %cst_53 = arith.constant dense<0.000000e+00> : vector<32xf32>
      %86 = vector.multi_reduction <add>, %85, %cst_53 [0] : vector<8x32xf32> to vector<32xf32>
      %87 = vector.shape_cast %86 : vector<32xf32> to vector<1x32xf32>
      %88 = arith.addf %83, %87 : vector<1x32xf32>
      %c0_54 = arith.constant 0 : index
      %c0_55 = arith.constant 0 : index
      %89 = vector.load %arg17[%c0_54, %c0_55] : memref<1x32xf32, #tpu.memory_space<vmem>>, vector<1x32xf32>
      tpu.vector_store %arg17[%c0_54, %c0_55], %88 {strides = array<i32>} : memref<1x32xf32, #tpu.memory_space<vmem>>, vector<1x32xf32>,
      %c0_56 = arith.constant 0 : index
      %c0_57 = arith.constant 0 : index
      %90 = vector.load %arg15[%c0_56, %c0_57] : memref<1x1xf32, #tpu.memory_space<vmem>>, vector<1x1xf32>
      tpu.vector_store %arg15[%c0_56, %c0_57], %69 {strides = array<i32>} : memref<1x1xf32, #tpu.memory_space<vmem>>, vector<1x1xf32>,
      %c1_i32 = arith.constant 1 : i32
      %91 = arith.cmpi eq, %arg1, %c1_i32 : i32
      %92 = arith.extui %91 : i1 to i32
      %c0_i32_58 = arith.constant 0 : i32
      %93 = arith.cmpi ne, %92, %c0_i32_58 : i32
      scf.if %93 {
        %c0_59 = arith.constant 0 : index
        %c0_60 = arith.constant 0 : index
        %94 = vector.load %arg17[%c0_59, %c0_60] : memref<1x32xf32, #tpu.memory_space<vmem>>, vector<1x32xf32>
        %c0_61 = arith.constant 0 : index
        %c0_62 = arith.constant 0 : index
        %95 = vector.load %arg16[%c0_61, %c0_62] : memref<1x1xf32, #tpu.memory_space<vmem>>, vector<1x1xf32>
        %96 = vector.broadcast %95 : vector<1x1xf32> to vector<1x32xf32>
        %97 = arith.divf %94, %96 : vector<1x32xf32>
        %c0_63 = arith.constant 0 : index
        %c0_64 = arith.constant 0 : index
        %c0_65 = arith.constant 0 : index
        %98 = vector.load %arg9[%c0_63, %c0_64, %c0_65] : memref<1x1x32xf32, #tpu.memory_space<vmem>>, vector<1x1x32xf32>
        %99 = vector.shape_cast %98 : vector<1x1x32xf32> to vector<1x32xf32>
        %100 = vector.shape_cast %97 : vector<1x32xf32> to vector<1x1x32xf32>
        tpu.vector_store %arg9[%c0_63, %c0_64, %c0_65], %100 {strides = array<i32>} : memref<1x1x32xf32, #tpu.memory_space<vmem>>, vector<1x1x32xf32>,
      } else {
      }
    } else {
    }
    return
  }
  func.func @transform_0(%arg0: i32, %arg1: i32, %arg2: i32) -> (i32, i32, i32) {
    %c0_i32 = arith.constant 0 : i32
    %c0_i32_0 = arith.constant 0 : i32
    return %arg0, %arg1, %c0_i32 : i32, i32, i32
  }
  func.func @transform_1(%arg0: i32, %arg1: i32, %arg2: i32) -> (i32, i32, i32) {
    %c0_i32 = arith.constant 0 : i32
    %c0_i32_0 = arith.constant 0 : i32
    return %arg0, %arg2, %c0_i32 : i32, i32, i32
  }
  func.func @transform_2(%arg0: i32, %arg1: i32, %arg2: i32) -> (i32, i32) {
    %c0_i32 = arith.constant 0 : i32
    %c0_i32_0 = arith.constant 0 : i32
    %c0_i32_1 = arith.constant 0 : i32
    return %c0_i32, %c0_i32_0 : i32, i32
  }
  func.func @transform_3(%arg0: i32, %arg1: i32, %arg2: i32) -> (i32, i32) {
    %c0_i32 = arith.constant 0 : i32
    %c0_i32_0 = arith.constant 0 : i32
    %c0_i32_1 = arith.constant 0 : i32
    return %c0_i32, %c0_i32_0 : i32, i32
  }
  func.func @transform_4(%arg0: i32, %arg1: i32, %arg2: i32) -> (i32, i32, i32) {
    %c0_i32 = arith.constant 0 : i32
    %c0_i32_0 = arith.constant 0 : i32
    return %arg0, %c0_i32, %arg2 : i32, i32, i32
  }
  func.func @transform_5(%arg0: i32, %arg1: i32, %arg2: i32) -> (i32, i32, i32) {
    %c0_i32 = arith.constant 0 : i32
    %c0_i32_0 = arith.constant 0 : i32
    return %arg0, %arg1, %c0_i32 : i32, i32, i32
  }
  func.func @transform_6(%arg0: i32, %arg1: i32, %arg2: i32) -> (i32, i32, i32) {
    %c0_i32 = arith.constant 0 : i32
    %c0_i32_0 = arith.constant 0 : i32
    %c0_i32_1 = arith.constant 0 : i32
    return %arg0, %c0_i32, %c0_i32_0 : i32, i32, i32
  }
}

</mosaic_0001>

<bundles_post_ra>
// kernel: biattention.3
= control target key start
LH: loop header
LB: loop body
LE: loop exit
PB: predicated region body
PF: predicated region fallthrough
CT: control target
= control target key end

     0   :  { %s710_s0 = inlined_call_operand.hbm [shape: f32[2,16,128], index: 0, kind: input, shape index: {}, may-alias: {0,2}]   ;;  %s711_s1 = inlined_call_operand.vmem [shape: f32[2,1,32], index: 1, kind: input, shape index: {}]   ;;  %s712_s2 = inlined_call_operand.hbm [shape: f32[2,16,128], index: 2, kind: output, shape index: {}, may-alias: {0,2}]  }
   0x1   :  { %713 = sst [smem:[#allocation8_spill]] %s710_s0 }
   0x2   :  { %7 = vsyncpa [#allocation3], 0 }
   0x3   :  { %9 = vsyncpa [#allocation3 + $0x1], 0 }
   0x4   :  { %10 = vsyncpa [#allocation4], 0 }
   0x5   :  { %12 = vsyncpa [#allocation4 + $0x1], 0  ;;  %s563_s9 = smov 0   ;;  %s565_s10 = smov 0  }
   0x6   :  { %s567_s11 = smov 0   ;;  %s569_s12 = smov 0  }
   0x7   :  { %s571_s13 = smov 0   ;;  %s573_s14 = smov 0  }
   0x8   :  { %s575_s15 = smov 0   ;;  %s577_s16 = smov 0  }
   0x9 LB: > { %s320_s17 = sadd.s32 4294967295, %s544_s16   ;;  %s321_s18 = sadd.s32 4294967294, %s544_s16   ;;  %s544_s16 = sphi %s577_s16, %s18_s16   ;;  %s540_s15 = sphi %s575_s15, %s725_s15   ;;  %s536_s14 = sphi %s573_s14, %s724_s14   ;;  %s532_s13 = sphi %s571_s13, %s723_s13   ;;  %s528_s12 = sphi %s569_s12, %s722_s12   ;;  %s524_s11 = sphi %s567_s11, %s721_s11   ;;  %s520_s10 = sphi %s565_s10, %s720_s10   ;;  %s516_s9 = sphi %s563_s9, %s719_s9  }
   0xa   : > { %s27_s19 = sadd.s32 1, %s536_s14  ;;  %s30_s20 = sadd.s32 1, %s540_s15 }
   0xb   : > { %p28_p0 = scmp.ge.s32.totalorder %s27_s19, 2  ;;  %s39_s21 = sadd.s32 1, %s524_s11 }
   0xc   : > { %p46_p1 = scmp.ne.s32.totalorder %s524_s11, %s520_s10  ;;  %p47_p2 = scmp.eq.s32.totalorder %s544_s16, 0 }
   0xd   : > { %s727_s19 = smov (%p28_p0, %s27_s19), 0  ;;  %s729_s20 = smov (!%p28_p0, %s30_s20), %s540_s15 }
   0xe   : > { %s35_s22 = ssub.s32 %s536_s14, %s727_s19  ;;  %p616_p3 = por %p47_p2, %p46_p1 }
   0xf   : > { %p32_p4 = scmp.ge.s32.totalorder %s729_s20, 2  ;;  %p52_p5 = scmp.ne.s32.totalorder %s520_s10, %s516_s9 }
  0x10   : > { %p53_p6 = scmp.eq.s32.totalorder %s320_s17, 0  ;;  %p104_p7 = scmp.eq.s32.totalorder %s320_s17, 3 }
  0x11   : > { %s731_s20 = smov (%p32_p4, %s729_s20), 0  ;;  %p110_p10 = scmp.eq.s32.totalorder %s321_s18, 3 }
  0x12   : > { %p624_p8 = por %p53_p6, %p52_p5  ;;  %p628_p9 = por %p104_p7, %p46_p1 }
  0x13   : > { %s34_s26 = ssub.s32 %s540_s15, %s731_s20  ;;  %p634_p12 = por %p110_p10, %p52_p5 }
  0x14   : > { %s36_s27 = sor.u32 %s35_s22, %s34_s26  ;;  %p347_p13 = scmp.lt.s32.totalorder %s544_s16, 4 }
  0x15   : > { %p37_p11 = scmp.eq.s32.totalorder %s36_s27, 0  ;;  %s130_s29 = sand.u32 1, %s524_s11  }
  0x16   : > { %s324_s3 = sshll.u32 %s130_s29, 3  ;;  %s325_s4 = sshll.u32 %s540_s15, 1 }
  0x17   : > { %s641_s30 = scalar_select %p37_p11, %s524_s11, %s39_s21  }
  0x18   : > { %s138_s5 = sadd.s32 %s536_s14, %s325_s4  ;;  %s134_s6 = scalar_lea.vmem [#allocation2], %s324_s3 }
  0x19   : > { %s144_s7 = sshll.u32 %s134_s6, 4  ;;  %s326_s8 = sshll.u32 %s138_s5, 3  ;;  %s145_s7 = int_to_ptr.vmem [resolvable:$true] %s144_s7 }
  0x1a   : > { %s718_s0 = sld [smem:[#allocation8_spill]]  ;;  %p340_p0 = pnand %p347_p13, %p616_p3 }
  0x1b   : > { %p327_p1 = scmp.ge.s32.totalorder %s544_s16, 1  ;;  %s131_s27 = scalar_lea.sflag [#allocation3], %s130_s29 }
  0x1c   : > { %p155_p2 = scmp.lt.s32.totalorder %s544_s16, 5 }
  0x1e   : > { %p156_p4 = pnand %p327_p1, %p155_p2 }
  0x1f   : > { %s653_s21 = sand.u32 (!%p156_p4), 1, %s520_s10  }
  0x20   : > { %s140_s22 = scalar_lea.hbm %s718_s0, %s326_s8  ;;  %159 = sbr.rel (%p156_p4) target bundleno = 280 (0x118), region = 28 }
  0x21   : > { %s142_s26 = sshll.u32 %s140_s22, 4  ;;  %s328_s3 = sshll.u32 (!%p156_p4), %s653_s21, 3  ;;  %s143_s26 = int_to_ptr.hbm [resolvable:$true] %s142_s26 }
  0x22   : > { %342 = dma.hbm_to_vmem [thread:$0]  (!%p340_p0), %s143_s26, 128, %s145_s7, %s131_s27  }
  0x23   : > { %s162_s4 = scalar_lea.sflag (!%p156_p4), [#allocation3], %s653_s21  ;;  %s165_s5 = scalar_lea.vmem (!%p156_p4), [#allocation2], %s328_s3 }
  0x25   : > { %507 = dma.done.wait (%p624_p8), %s162_s4, 128  }
  0x26   : > { %509 = vsyncadd (%p624_p8), %s162_s4, 4294967168  ;;  %p190_p3 = scmp.lt.s32.totalorder %s532_s13, 1  ;;  %s546_s8 = smov 32   ;;  %v193_v1 = vld [vmem:[%s165_s5] sm:$0xff]  ;;  %vm205_vm0 = vcmask 785408  }
  0x27   : > { %s547_s17 = smov 64   ;;  %s331_s24 = sshll.u32 %s532_s13, 1 }
  0x28   : > { %s191_s23 = scalar_select %p190_p3, %s532_s13, 1 }
  0x29   : > { %s219_s18 = sadd.s32 %s528_s12, %s331_s24  ;;  %s189_s0 = scalar_lea.vmem [#allocation5], %s328_s3 }
  0x2a   : > { %s192_s7 = scalar_lea.vmem %s711_s1, %s191_s23  ;;  %s332_s22 = sshll.u32 %s219_s18, 3 }
  0x2b   : > { %v415_v0 = vld [vmem:[%s192_s7] ss:$0 sm:$0xff]  ;;  %s221_s4 = scalar_lea.hbm %s712_s2, %s332_s22  ;;  %s223_s29 = sshll.u32 %s189_s0, 4  ;;  %s224_s29 = int_to_ptr.vmem [resolvable:$true] %s223_s29 }
  0x2c   : > { %197 = vrot.lane.b32.xlu0 %v415_v0, %s546_s8  ;;  %s225_s23 = sshll.u32 %s221_s4, 4  ;;  %s209_s5 = scalar_lea.sflag [#allocation4], %s653_s21  ;;  %s226_s23 = int_to_ptr.hbm [resolvable:$true] %s225_s23 }
  0x2d   : > { %s460_s6 = sshra.s32 %s226_s23, 4  ;;  %s466_s3 = scalar_lea.hbm %s712_s2, 32  ;;  %s461_s6 = int_to_ptr.hbm [resolvable:$true] %s460_s6 }
  0x2e   : > { %s462_s13 = scalar_lea.hbm %s461_s6, 8  ;;  %p467_p8 = scmp.lt.s32.totalorder %s461_s6, %s712_s2 }
  0x2f   : > { %p463_p5 = scmp.ne.s32.totalorder %s461_s6, %s462_s13  ;;  %p468_p10 = scmp.lt.s32.totalorder %s466_s3, %s462_s13 }
  0x31   : > { %p464_p6 = pnand %p463_p5, %p628_p9  ;;  %p469_p11 = por %p468_p10, %p467_p8 }
  0x33   : > { %p465_p7 = pneg %p464_p6 }
  0x35   : > { %p470_p13 = pnand %p469_p11, %p465_p7 }
  0x9e   : > { %v198_v2 = vpop.permute.xlu0 %197 }
  0x9f   : > { %v200_v3 = vmul.f32 %v198_v2, %v193_v1 }
  0xa1   : > { %202 = vrot.lane.b32.xlu0 %v200_v3, %s547_s17 }
 0x113   : > { %v203_v4 = vpop.permute.xlu0 %202 }
 0x114   : > { %v206_v5 = vsel %vm205_vm0, %v193_v1, %v203_v4 }
 0x115   : > { %207 = vst [vmem:[%s189_s0] sm:$0xff] %v206_v5 }
 0x116   : > { %473 = shalt.err (!%p470_p13)
}
 0x117   : > { %337 = dma.vmem_to_hbm [thread:$0]  (%p628_p9), %s224_s29, 128, %s226_s23, %s209_s5  }
 0x118 PF: > { %p348_p0 = scmp.ge.s32.totalorder %s544_s16, 2  ;;  %s237_s0 = sand.u32 1, %s516_s9  }
 0x119   : > { %s238_s21 = scalar_lea.sflag [#allocation4], %s237_s0 }
 0x11a   : > { %p344_p1 = pnand %p348_p0, %p634_p12 }
 0x11c   : > { %p345_p2 = pneg %p344_p1 }
 0x11e   : > { %511 = dma.done.wait (%p345_p2), %s238_s21, 128  }
 0x11f   : > { %513 = vsyncadd (%p345_p2), %s238_s21, 4294967168  ;;  %s18_s16 = sadd.s32 1, %s544_s16   ;;  %s719_s9 = smov %s520_s10 }
 0x120   : > { %p15_p4 = scmp.ge.s32.totalorder %s18_s16, 6   ;;  %s720_s10 = smov %s524_s11 }
 0x121   : > { %s721_s11 = smov %s641_s30  ;;  %s722_s12 = smov %s536_s14 }
 0x122   : > { %s723_s13 = smov %s540_s15  ;;  %s724_s14 = smov %s727_s19 }
 0x123   : > { %s725_s15 = smov %s731_s20  ;;  %17 = sbr.rel (!%p15_p4) target bundleno = 9 (0x9), region = 76 }
 0x128   :  { %244 = vsyncpa [#allocation3], 1 }
 0x129   :  { %246 = vsyncpa [#allocation3 + $0x1], 1 }
 0x12a   :  { %247 = vsyncpa [#allocation4], 1 }
 0x12b   :  { %249 = vsyncpa [#allocation4 + $0x1], 1 }

// kernel: biattention.2
= control target key start
LH: loop header
LB: loop body
LE: loop exit
PB: predicated region body
PF: predicated region fallthrough
CT: control target
= control target key end

     0   :  { %12 = vsyncpa [#allocation11], 0  ;;  %s1336_s0 = inlined_call_operand.vmem [shape: f32[2,16,32], index: 0, kind: input, shape index: {}]   ;;  %s1337_s1 = inlined_call_operand.vmem [shape: bf16[2,128,32], index: 1, kind: input, shape index: {}]   ;;  %s1338_s2 = inlined_call_operand.vmem [shape: f32[1,32], index: 2, kind: input, shape index: {}]   ;;  %s1339_s3 = inlined_call_operand.vmem [shape: f32[1,32], index: 3, kind: input, shape index: {}]   ;;  %s1340_s4 = inlined_call_operand.vmem [shape: f32[2,1,128], index: 4, kind: input, shape index: {}]   ;;  %s1341_s5 = inlined_call_operand.hbm [shape: f32[2,16,128], index: 5, kind: output, shape index: {0}]   ;;  %s1342_s6 = inlined_call_operand.vmem [shape: f32[2,1,32], index: 6, kind: output, shape index: {1}]  }
   0x1   :  { %14 = vsyncpa [#allocation11 + $0x1], 0  ;;  %s1128_s21 = smov 0   ;;  %s1130_s22 = smov 0  }
   0x2   :  { %s1132_s23 = smov 0   ;;  %s1134_s24 = smov 0  }
   0x3   :  { %s1136_s25 = smov 0   ;;  %s1138_s26 = smov 0  }
   0x4   :  { %s1140_s27 = smov 0   ;;  %s1142_s28 = smov 0  }
   0x5 LB: > { %1350 = sst [smem:[#allocation13_spill]] %s1062_s23  ;;  %s828_s29 = sadd.s32 4294967295, %s1082_s28   ;;  %s1082_s28 = sphi %s1142_s28, %s20_s28   ;;  %s1078_s27 = sphi %s1140_s27, %s1366_s27   ;;  %s1074_s26 = sphi %s1138_s26, %s1365_s26   ;;  %s1070_s25 = sphi %s1136_s25, %s1364_s25   ;;  %s1066_s24 = sphi %s1134_s24, %s1363_s24   ;;  %s1062_s23 = sphi %s1132_s23, %s1362_s23   ;;  %s1058_s22 = sphi %s1130_s22, %s1368_s22   ;;  %s1054_s21 = sphi %s1128_s21, %s1367_s21  }
   0x6   : > { %1351 = sst [smem:[#allocation14_spill]] %s1074_s26  ;;  %s829_s30 = sadd.s32 4294967294, %s1082_s28  }
   0x7   : > { %1352 = sst [smem:[#allocation15_spill]] %s1078_s27  ;;  %s35_s7 = sadd.s32 1, %s1074_s26 }
   0x8   : > { %p37_p0 = scmp.ge.s32.totalorder %s35_s7, 2  ;;  %s39_s8 = sadd.s32 1, %s1078_s27 }
   0x9   : > { %p184_p1 = scmp.ne.s32.totalorder %s1062_s23, %s1058_s22  ;;  %p185_p2 = scmp.eq.s32.totalorder %s828_s29, 3 }
   0xa   : > { %s1370_s7 = smov (%p37_p0, %s35_s7), 0  ;;  %s1372_s8 = smov (!%p37_p0, %s39_s8), %s1078_s27 }
   0xb   : > { %1353 = sst [smem:[#allocation16_spill]] %s1370_s7  ;;  %s170_s9 = ssub.s32 %s1074_s26, %s1370_s7 }
   0xc   : > { %p1179_p3 = por %p185_p2, %p184_p1  ;;  %p41_p4 = scmp.ge.s32.totalorder %s1372_s8, 2 }
   0xd   : > { %p190_p5 = scmp.ne.s32.totalorder %s1058_s22, %s1054_s21  ;;  %p191_p6 = scmp.eq.s32.totalorder %s829_s30, 3 }
   0xe   : > { %p832_p7 = scmp.ge.s32.totalorder %s1082_s28, 1  ;;  %s1374_s8 = smov (%p41_p4, %s1372_s8), 0 }
   0xf   : > { %1355 = sst [smem:[#allocation17_spill]] %s1374_s8  ;;  %p1188_p8 = por %p191_p6, %p190_p5 }
  0x10   : > { %p274_p9 = scmp.lt.s32.totalorder %s1082_s28, 5  ;;  %s169_s12 = ssub.s32 %s1078_s27, %s1374_s8 }
  0x11   : > { %s1356_s11 = scalar_select %p1188_p8, 1, 0 }
  0x12   : > { %s174_s13 = sadd.s32 1, %s1062_s23  ;;  %s171_s14 = sor.u32 %s170_s9, %s169_s12 }
  0x13   : > { %1357 = sst [smem:[#allocation18_spill]] %s1356_s11  ;;  %p275_p10 = pnand %p832_p7, %p274_p9 }
  0x14   : > { %p172_p11 = scmp.eq.s32.totalorder %s171_s14, 0  ;;  %s1343_s16 = sand.u32 (!%p275_p10), 1, %s1058_s22  }
  0x15   : > { %278 = sbr.rel (%p275_p10) target bundleno = 1083 (0x43b), region = 40  ;;  %p325_p12 = scmp.lt.s32.totalorder (!%p275_p10), %s1070_s25, 1 }
  0x16   : > { %s1197_s15 = scalar_select %p172_p11, %s1062_s23, %s174_s13  }
  0x17   : > { %s1203_s17 = sshll.u32 (!%p275_p10), %s1343_s16, 3  ;;  %p327_p13 = scmp.lt.s32.totalorder (!%p275_p10), %s1066_s24, 1 }
  0x18   : > { %1358 = sst [smem:[#allocation19_spill]] %s1197_s15  ;;  %p379_p0 = scmp.eq.s32.totalorder (!%p275_p10), %s1066_s24, 0 }
  0x19   : > { %s319_s26 = scalar_lea.vmem (!%p275_p10), [#allocation10], %s1203_s17 }
  0x1a   : > { %vm370_vm0 = vcmask 261120   ;;  %s1208_s18 = scalar_select %p325_p12, %s1070_s25, 1  ;;  %v1084_v0 = vmov 0.0   ;;  %v969_v1 = vld [vmem:[%s1339_s3] ss:$0 sm:$0xff]  ;;  %vm363_vm1 = vcmask 257024  }
  0x1b   : > { %378 = vst.msk [vmem:[#allocation6] sm:$0xff] %vm370_vm0, %v1084_v0  ;;  %s328_s19 = scalar_select %p327_p13, %s1066_s24, 1  ;;  %v970_v2 = vld [vmem:[%s1338_s2] ss:$0 sm:$0xff]  ;;  %vm374_vm2 = vcmask 7168   ;;  %v1085_v8 = vmov -inf  }
  0x1c   : > { %s834_s20 = sshll.u32 %s1208_s18, 1  ;;  %s879_s29 = sshll.u32 %s1208_s18, 6  ;;  %376 = vst.msk [vmem:[#allocation4] sm:$0xff] %vm374_vm2, %v1085_v8  ;;  %vm384_vm3 = vcmask (%p379_p0), 0   ;;  %vm387_vm4 = vcmask (%p379_p0), 253952   ;;  %v1086_v10 = vmov (%p379_p0), -inf  }
  0x1d   : > { %s330_s30 = sadd.s32 %s834_s20, %s328_s19  ;;  %s1217_s13 = scalar_lea.vmem %s1337_s1, %s879_s29  ;;  %377 = vst.msk [vmem:[#allocation5] sm:$0xff] %vm374_vm2, %v1084_v0  ;;  %v1087_v11 = vmov (%p379_p0), 0.0  }
  0x1e   : > { %s835_s27 = sshll.u32 %s330_s30, 3  ;;  %s348_s23 = scalar_lea.vmem %s1340_s4, %s1208_s18  ;;  %385 = vst.msk [vmem:[#allocation7] sm:$0x1] (%p379_p0), %vm384_vm3, %v1086_v10 }
  0x1f   : > { %s1232_s20 = scalar_lea.vmem %s1336_s0, %s835_s27  ;;  %s351_s16 = scalar_lea.vmem %s1342_s6, %s1208_s18  ;;  %386 = vst.msk [vmem:[#allocation8] sm:$0x1] (%p379_p0), %vm384_vm3, %v1087_v11 }
  0x20   : > { %v356_v3 = vld [vmem:[%s1232_s20] sm:$0xff]  ;;  %388 = vst.msk [vmem:[#allocation9] sm:$0x1] (%p379_p0), %vm387_vm4, %v1087_v11 }
  0x21   : > { %v361_v4 = vmul.f32 %v969_v1, %v356_v3  ;;  %v369_v5 = vmul.f32 %v970_v2, %v356_v3 }
  0x23   : > { %v362_v6 = vpack.c.bf16 %v361_v4, %v361_v4  ;;  %v371_v7 = vsel %vm370_vm0, %v369_v5, 0.0 }
  0x24   : > { %372 = vadd.xlane.f32.xlu0 %v371_v7 }
  0x25   : > { %364 = vst.msk [vmem:[#allocation2] sm:$0xf] %vm363_vm1, %v362_v6 }
  0x94   : > { %383 = sbr.rel (!%p379_p0) target bundleno = 153 (0x99), region = 48 }
  0x97   : > { %v373_v9 = vpop.xlane.xlu0 %372 }
  0x98   : > { %375 = vst.msk [vmem:[#allocation3] sm:$0xff] %vm374_vm2, %v373_v9 }
  0x99 PF: > { %v888_v12 = vld [vmem:[%s1217_s13 + $0x38] sm:$0xff]  ;;  %v887_v14 = vld [vmem:[%s1217_s13 + $0x30] sm:$0xff]  ;;  %v886_v16 = vld [vmem:[%s1217_s13 + $0x28] sm:$0xff]  ;;  %v1088_v26 = vmov 0   ;;  %v584_v37 = vlaneseq  ;;  %s872_s8 = sshll.u32 %s1066_s24, 3  ;;  %vm619_vm6 = vcmask 0  }
  0x9a   : > { %v478_v13 = vsel %vm370_vm0, %v888_v12, 0  ;;  %536 = vmatpush.bf16.msra.mxu1 %v888_v12  ;;  %v475_v15 = vsel %vm370_vm0, %v887_v14, 0  ;;  %v885_v17 = vld [vmem:[%s1217_s13 + $0x20] sm:$0xff]  ;;  %v472_v18 = vsel %vm370_vm0, %v886_v16, 0  ;;  %v884_v19 = vld [vmem:[%s1217_s13 + $0x18] sm:$0xff]  ;;  %v883_v20 = vld [vmem:[%s1217_s13 + $0x10] sm:$0xff]  ;;  %971 = vset.pattern.permute.xlu0 %v1088_v26  ;;  %v586_v42 = vstv %s872_s8 }
  0x9b   : > { %480 = vmatpush.bf16.xpose.msra.mxu0 %v478_v13  ;;  %v469_v21 = vsel %vm370_vm0, %v885_v17, 0  ;;  %v882_v22 = vld [vmem:[%s1217_s13 + $0x8] sm:$0xff]  ;;  %v881_v23 = vld [vmem:[%s1217_s13] sm:$0xff]  ;;  %v466_v24 = vsel %vm370_vm0, %v884_v19, 0  ;;  %972 = vset.pattern.permute.xlu1 %v1088_v26  ;;  %v463_v27 = vsel %vm370_vm0, %v883_v20, 0  ;;  %v585_v40 = vshrl.u32 %v584_v37, 7 }
  0x9c   : > { %973 = vset.pattern.permute.xlu2 %v1088_v26  ;;  %v460_v28 = vsel %vm370_vm0, %v882_v22, 0  ;;  %v457_v29 = vsel %vm370_vm0, %v881_v23, 0  ;;  %v405_v30 = vld [vmem:[#allocation2] sm:$0xf]  ;;  %v498_v38 = vld [vmem:[#allocation4] sm:$0xff]  ;;  %s1090_s11 = smov 64  }
  0x9d   : > { %v974_v32 = vld [vmem:[%s348_s23] ss:$0 sm:$0xff]  ;;  %v587_v44 = vadd.s32 %v586_v42, %v585_v40  ;;  %v598_v55 = vld [vmem:[#allocation7] sm:$0x1]  ;;  %v609_v6 = vld [vmem:[#allocation8] sm:$0x1] }
  0x9e   : > { %537 = vmatpush.bf16.msra.mxu1 %v887_v14  ;;  %s1089_s23 = smov 32   ;;  %v621_v42 = vld [vmem:[#allocation9] sm:$0x1]  ;;  %s1091_s15 = smov 96   ;;  %vm643_vm7 = vcmask 253952   ;;  %vm578_vm8 = vcmask 523264  }
  0x9f   : > { %v406_v25 = vld [vmem:[#allocation3] sm:$0xff]  ;;  %vm588_vm5 = vcmp.lt.s32.totalorder %v587_v44, 16  ;;  %vm580_vm9 = vcmask 785408   ;;  %p873_p1 = scmp.ne.s32.totalorder %s1066_s24, 1 }
  0xa0   : > { %409 = vperm.xlu0 %971, %v406_v25  }
  0xa2   : > { %538 = vmatpush.bf16.msra.mxu1 %v886_v16  ;;  %v513_v16 = vld [vmem:[#allocation5] sm:$0xff] }
  0xa3   : > { %481 = vmatpush.bf16.xpose.msra.mxu0 %v475_v15 }
  0xa6   : > { %539 = vmatpush.bf16.msra.mxu1 %v885_v17 }
  0xaa   : > { %540 = vmatpush.bf16.msra.mxu1 %v884_v19 }
  0xab   : > { %482 = vmatpush.bf16.xpose.msra.mxu0 %v472_v18 }
  0xae   : > { %541 = vmatpush.bf16.msra.mxu1 %v883_v20  ;;  %v520_v20 = vld [vmem:[#allocation6] sm:$0xff] }
  0xb2   : > { %542 = vmatpush.bf16.msra.mxu1 %v882_v22 }
  0xb3   : > { %483 = vmatpush.bf16.xpose.msra.mxu0 %v469_v21 }
  0xb6   : > { %543 = vmatpush.bf16.msra.mxu1 %v881_v23 }
  0xbb   : > { %484 = vmatpush.bf16.xpose.msra.mxu0 %v466_v24 }
  0xc3   : > { %485 = vmatpush.bf16.xpose.msra.mxu0 %v463_v27 }
  0xcb   : > { %486 = vmatpush.bf16.xpose.msra.mxu0 %v460_v28 }
  0xd3   : > { %487 = vmatpush.bf16.xpose.msra.mxu0 %v457_v29 }
  0xda   : > { %871 = vmatmul.msk.bf16.vlgmr.msra.gmra.mxu0 %vm370_vm0, %v405_v30 }
 0x112   : > { %v410_v31 = vpop.permute.xlu0 %409 }
 0x157   : > { %v489_v33 = vpop.f32.mrf.mxu0 }
 0x158   : > { %v490_v34 = vadd.f32 %v489_v33, %v410_v31  ;;  %v555_v31 = vld [vmem:[%s1232_s20] sm:$0xff] }
 0x15a   : > { %v497_v35 = vadd.f32 %v974_v32, %v490_v34 }
 0x15c   : > { %499 = vmax.xlane.f32.xlu0 %v497_v35 }
 0x15f   : > { %v491_v36 = vpop.f32.mrf.mxu0 }
 0x1cf   : > { %v500_v39 = vpop.xlane.xlu0 %499 }
 0x1d0   : > { %v501_v41 = vmax.f32 %v498_v38, %v500_v39 }
 0x1d2   : > { %v502_v43 = vsub.f32 %v498_v38, %v501_v41  ;;  %551 = vst.msk [vmem:[#allocation4] sm:$0xff] %vm374_vm2, %v501_v41  ;;  %507 = vperm.xlu1 %972, %v501_v41  }
 0x1d4   : > { %v503_v45 = vmul.f32 1.442695, %v502_v43 }
 0x1d6   : > { %975 = vpow2.f32 %v503_v45 }
 0x1d9   : > { %v589_v46 = vld [vmem:[#allocation4] sm:$0xff] }
 0x1da   : > { %v590_v47 = vsel %vm588_vm5, %v589_v46, -inf }
 0x1db   : > { %v591_v48 = vsel %vm374_vm2, %v590_v47, -inf }
 0x1dc   : > { %v976_v49 = vpop.eup %975  ;;  %v592_v50 = vrot.slane %v591_v48, 4 }
 0x1dd   : > { %523 = vperm.xlu2 %973, %v976_v49   ;;  %v514_v17 = vmul.f32 %v976_v49, %v513_v16 }
 0x1de   : > { %v593_v51 = vmax.f32 %v591_v48, %v592_v50 }
 0x1e0   : > { %v594_v52 = vrot.slane %v593_v51, 2 }
 0x1e2   : > { %v595_v53 = vmax.f32 %v593_v51, %v594_v52 }
 0x1e4   : > { %v596_v54 = vrot.slane %v595_v53, 1 }
 0x1e6   : > { %v597_v56 = vmax.f32 %v595_v53, %v596_v54 }
 0x1e8   : > { %v599_v57 = vmax.f32 %v598_v55, %v597_v56 }
 0x1ea   : > { %v604_v58 = vperm.slane %v599_v57, 0  ;;  %645 = vst.msk [vmem:[#allocation7] sm:$0x1] %vm619_vm6, %v599_v57  ;;  %v600_v61 = vsub.f32 %v598_v55, %v599_v57 }
 0x1ec   : > { %v606_v59 = vsub.f32 %v590_v47, %v604_v58  ;;  %v601_v62 = vmul.f32 1.442695, %v600_v61 }
 0x1ee   : > { %v607_v60 = vmul.f32 1.442695, %v606_v59 }
 0x1f0   : > { %977 = vpow2.f32 %v607_v60 }
 0x1f1   : > { %979 = vpow2.f32 %v601_v62 }
 0x1f6   : > { %v978_v63 = vpop.eup %977 }
 0x1f7   : > { %v611_v0 = vsel %vm374_vm2, %v978_v63, 0.0  ;;  %v980_v5 = vpop.eup %979 }
 0x1f8   : > { %v612_v1 = vrot.slane %v611_v0, 4  ;;  %v610_v8 = vmul.f32 %v980_v5, %v609_v6 }
 0x1fa   : > { %v613_v2 = vadd.f32 %v612_v1, %v611_v0 }
 0x1fc   : > { %v614_v3 = vrot.slane %v613_v2, 2 }
 0x1fe   : > { %v615_v4 = vadd.f32 %v614_v3, %v613_v2 }
 0x200   : > { %v616_v7 = vrot.slane %v615_v4, 1 }
 0x202   : > { %v617_v9 = vadd.f32 %v616_v7, %v615_v4 }
 0x204   : > { %v618_v10 = vadd.f32 %v617_v9, %v610_v8 }
 0x206   : > { %620 = vst.msk [vmem:[#allocation8] sm:$0x1] %vm619_vm6, %v618_v10 }
 0x237   : > { %v524_v21 = vpop.permute.xlu2 %523 }
 0x238   : > { %v526_v23 = vmul.f32 %v524_v21, %v520_v20 }
 0x244   : > { %v508_v11 = vpop.permute.xlu1 %507 }
 0x245   : > { %v510_v12 = vsub.f32 %v497_v35, %v508_v11 }
 0x247   : > { %v511_v13 = vmul.f32 1.442695, %v510_v12 }
 0x249   : > { %981 = vpow2.f32 %v511_v13 }
 0x24f   : > { %v982_v14 = vpop.eup %981 }
 0x250   : > { %515 = vadd.xlane.f32.xlu1 %v982_v14  ;;  %v527_v15 = vpack.c.bf16 %v982_v14, %v982_v14 }
 0x252   : > { %544 = vmatmul.bf16.vlgmr.msra.gmra.mxu1 %v527_v15 }
 0x2c3   : > { %v516_v18 = vpop.xlane.xlu1 %515 }
 0x2c4   : > { %v517_v19 = vadd.f32 %v516_v18, %v514_v17 }
 0x2c6   : > { %519 = vst.msk [vmem:[#allocation5] sm:$0xff] %vm374_vm2, %v517_v19 }
 0x2cd   : > { %v557_v22 = vld [vmem:[#allocation5] sm:$0xff] }
 0x2ce   : > { %983 = vrcp.f32 %v557_v22 }
 0x2cf   : > { %v545_v24 = vpop.f32.mrf.mxu1 }
 0x2d0   : > { %v549_v25 = vadd.f32 %v545_v24, %v526_v23 }
 0x2d2   : > { %550 = vst.msk [vmem:[#allocation6] sm:$0xff] %vm370_vm0, %v549_v25 }
 0x2d4   : > { %v984_v26 = vpop.eup %983 }
 0x2d5   : > { %561 = vperm.xlu2 %973, %v984_v26  }
 0x2d7   : > { %v547_v27 = vpop.f32.mrf.mxu1 }
 0x2d9   : > { %v556_v28 = vld [vmem:[#allocation6] sm:$0xff] }
 0x2dd   : > { %631 = vperm.xlu2 %973, %v978_v63  }
 0x2e5   : > { %624 = vperm.xlu2 %973, %v980_v5  }
 0x32f   : > { %v562_v29 = vpop.permute.xlu2 %561 }
 0x330   : > { %v564_v30 = vmul.f32 %v562_v29, %v556_v28 }
 0x332   : > { %567 = vrot.lane.b32.xlu2 %v564_v30, %s1089_s23  ;;  %v565_v34 = vmul.f32 %v564_v30, %v555_v31 }
 0x337   : > { %v632_v32 = vpop.permute.xlu2 %631 }
 0x338   : > { %v634_v33 = vmul.f32 %v632_v32, %v555_v31 }
 0x33a   : > { %v635_v35 = vsel %vm370_vm0, %v634_v33, 0.0  ;;  %571 = vrot.lane.b32.xlu2 %v565_v34, %s1090_s11 }
 0x33b   : > { %v636_v36 = vrot.slane %v635_v35, 4 }
 0x33d   : > { %v637_v37 = vadd.f32 %v636_v36, %v635_v35 }
 0x33f   : > { %v638_v38 = vrot.slane %v637_v37, 2  ;;  %v625_v39 = vpop.permute.xlu2 %624 }
 0x340   : > { %v627_v41 = vperm.slane %v625_v39, 0 }
 0x341   : > { %v639_v40 = vadd.f32 %v638_v38, %v637_v37 }
 0x342   : > { %574 = vrot.lane.b32.xlu2 %v564_v30, %s1091_s15  ;;  %v628_v45 = vmul.f32 %v627_v41, %v621_v42 }
 0x343   : > { %v640_v43 = vrot.slane %v639_v40, 1 }
 0x345   : > { %v641_v44 = vadd.f32 %v640_v43, %v639_v40 }
 0x347   : > { %v642_v46 = vadd.f32 %v641_v44, %v628_v45 }
 0x349   : > { %644 = vst.msk [vmem:[#allocation9] sm:$0x1] %vm643_vm7, %v642_v46 }
 0x38c   : > { %v568_v47 = vpop.permute.xlu2 %567 }
 0x38d   : > { %v577_v49 = vsel %vm370_vm0, %v555_v31, %v568_v47 }
 0x394   : > { %v572_v48 = vpop.permute.xlu2 %571 }
 0x395   : > { %v579_v50 = vsel %vm578_vm8, %v577_v49, %v572_v48 }
 0x39a   : > { %649 = sbr.rel (%p873_p1) target bundleno = 1066 (0x42a), region = 56 }
 0x39c   : > { %v575_v51 = vpop.permute.xlu2 %574 }
 0x39d   : > { %v581_v52 = vsel %vm580_vm9, %v579_v50, %v575_v51 }
 0x39e   : > { %582 = vst [vmem:[%s319_s26] sm:$0xff] %v581_v52 }
 0x39f   : > { %v651_v53 = vld [vmem:[#allocation8] sm:$0x1]  ;;  %v1092_v54 = vmov 0   ;;  %v650_v0 = vld [vmem:[#allocation9] sm:$0x1] }
 0x3a0   : > { %985 = vset.pattern.permute.xlu0 %v1092_v54 }
 0x3a1   : > { %654 = vperm.xlu0 %985, %v651_v53  }
 0x413   : > { %v655_v55 = vpop.permute.xlu0 %654 }
 0x414   : > { %v657_v56 = vperm.slane %v655_v55, 0 }
 0x416   : > { %986 = vrcp.f32 %v657_v56  ;;  %v669_v60 = vand.u32 2147483648, %v657_v56  ;;  %v667_v62 = vand.u32 2147483647, %v657_v56  ;;  %vm663_vm11 = vweird.f32 %v657_v56 }
 0x418   : > { %v670_v1 = vor.u32 1.1754944e-38, %v669_v60  ;;  %vm668_vm13 = vcmp.eq.f32.partialorder %v667_v62, 8.507059e+37 }
 0x41c   : > { %v987_v57 = vpop.eup %986 }
 0x41d   : > { %v659_v58 = vmul.f32 %v987_v57, %v657_v56  ;;  %vm664_vm10 = vweird.f32 %v987_v57 }
 0x41e   : > { %vm665_vm12 = vmor %vm663_vm11, %vm664_vm10 }
 0x41f   : > { %v660_v59 = vsub.f32 1.0, %v659_v58 }
 0x421   : > { %v661_v61 = vmul.f32 %v987_v57, %v660_v59 }
 0x423   : > { %v662_v63 = vadd.f32 %v987_v57, %v661_v61 }
 0x425   : > { %v666_v2 = vsel %vm665_vm12, %v987_v57, %v662_v63 }
 0x426   : > { %v671_v3 = vsel %vm668_vm13, %v670_v1, %v666_v2 }
 0x427   : > { %v672_v4 = vmul.f32 %v671_v3, %v650_v0 }
 0x429   : > { %673 = vst.msk [vmem:[%s351_s16] sm:$0x1] %vm643_vm7, %v672_v4 }
 0x42a PF: > { %s875_s13 = sshll.u32 %s1070_s25, 1  ;;  %s692_s19 = sshll.u32 %s319_s26, 4  ;;  %s693_s19 = int_to_ptr.vmem [resolvable:$true] %s692_s19 }
 0x42b   : > { %s688_s14 = sadd.s32 %s1066_s24, %s875_s13  ;;  %s1359_s18 = sand.u32 1, %s1058_s22  }
 0x42c   : > { %s876_s20 = sshll.u32 %s688_s14, 3  ;;  %s675_s16 = scalar_lea.sflag [#allocation11], %s1359_s18 }
 0x42d   : > { %s690_s27 = scalar_lea.hbm %s1341_s5, %s876_s20  ;;  %s1008_s17 = scalar_lea.hbm %s1341_s5, 32 }
 0x42e   : > { %s694_s7 = sshll.u32 %s690_s27, 4  ;;  %s695_s7 = int_to_ptr.hbm [resolvable:$true] %s694_s7 }
 0x42f   : > { %s1002_s8 = sshra.s32 %s695_s7, 4  ;;  %s1003_s8 = int_to_ptr.hbm [resolvable:$true] %s1002_s8 }
 0x430   : > { %s1004_s23 = scalar_lea.hbm %s1003_s8, 8  ;;  %p1009_p6 = scmp.lt.s32.totalorder %s1003_s8, %s1341_s5 }
 0x431   : > { %p1005_p2 = scmp.ne.s32.totalorder %s1003_s8, %s1004_s23  ;;  %p1010_p7 = scmp.lt.s32.totalorder %s1008_s17, %s1004_s23 }
 0x433   : > { %p1006_p4 = pnand %p1005_p2, %p1179_p3  ;;  %p1011_p9 = por %p1010_p7, %p1009_p6 }
 0x435   : > { %p1007_p5 = pneg %p1006_p4 }
 0x437   : > { %p1012_p10 = pnand %p1011_p9, %p1007_p5 }
 0x439   : > { %1015 = shalt.err (!%p1012_p10)
}
 0x43a   : > { %889 = dma.vmem_to_hbm [thread:$0]  (%p1179_p3), %s693_s19, 128, %s695_s7, %s675_s16  }
 0x43b PF: > { %p895_p11 = scmp.ge.s32.totalorder %s1082_s28, 2  ;;  %s709_s30 = sand.u32 1, %s1054_s21  }
 0x43c   : > { %s710_s12 = scalar_lea.sflag [#allocation11], %s709_s30 }
 0x43d   : > { %p892_p12 = pnand %p895_p11, %p1188_p8 }
 0x43f   : > { %p893_p13 = pneg %p892_p12 }
 0x441   : > { %1049 = dma.done.wait (%p893_p13), %s710_s12, 128  }
 0x442   : > { %1051 = vsyncadd (%p893_p13), %s710_s12, 4294967168  ;;  %s20_s28 = sadd.s32 1, %s1082_s28   ;;  %s1361_s13 = sld [smem:[#allocation13_spill]] }
 0x443   : > { %p17_p0 = scmp.ge.s32.totalorder %s20_s28, 6   ;;  %s1362_s23 = sld [smem:[#allocation19_spill]] }
 0x444   : > { %s1363_s24 = sld [smem:[#allocation14_spill]]  ;;  %s1367_s21 = smov %s1058_s22 }
 0x445   : > { %s1364_s25 = sld [smem:[#allocation15_spill]]  ;;  %19 = sbr.rel (!%p17_p0) target bundleno = 5 (0x5), region = 109 }
 0x446   : > { %s1365_s26 = sld [smem:[#allocation16_spill]] }
 0x447   : > { %s1366_s27 = sld [smem:[#allocation17_spill]] }
 0x448   : > { %s1368_s22 = smov %s1361_s13 }
 0x44a   :  { %722 = vsyncpa [#allocation11], 1 }
 0x44b   :  { %724 = vsyncpa [#allocation11 + $0x1], 1 }

</bundles_post_ra>
